<compile_context>
chip_gen: v5e
topology: v5e:2x2
jax: 0.10.0
libtpu: 0.0.40
codegen_flags: <defaults>
</compile_context>

<pallas_src>
import functools

import jax
import jax.numpy as jnp
from jax.experimental import pallas as pl
from jax.experimental.pallas import tpu as pltpu


_LANE = 128           # lane width: feature dims padded to multiples of this
_SUBLANE_BF16 = 16    # bf16 sublane packing: batch tiles are multiples of this
_NEG_BIG = -1e30      # bias fill for padded softmax logits -> exp() == 0


def _round_up(x: int, m: int) -> int:
    return ((x + m - 1) // m) * m


def _cdiv(a: int, b: int) -> int:
    return -(-a // b)


def _tpu_budget_and_cores():
    """(usable VMEM budget in bytes, TensorCores per device) — best effort."""
    cap = 64 << 20          # conservative fallback = smallest (v7x per-TC) VMEM
    cores = 1
    try:
        info = pltpu.get_tpu_info()
        cap = int(getattr(info, "vmem_capacity_bytes", 0)) or cap
        for name in ("num_cores", "core_count", "tensorcore_count",
                     "num_tensorcores"):
            v = getattr(info, name, None)
            if isinstance(v, int) and v > 0:
                cores = v
                break
    except Exception:
        pass
    # ~85% of physical VMEM: headroom for compiler-internal scratch, spills
    # and DMA descriptors (never request exactly physical).
    return int(cap * 0.85), cores


def _fused_mlp_kernel(*refs, activations):
    """Fused MLP body for one batch tile.

    refs = (x_ref, w0, b0, w1, b1, ..., o_ref)
      x_ref : (tile_n, D0_pad)    bf16
      w_i   : (Di_pad, Di+1_pad)  bf16  (full-resident, constant index_map)
      b_i   : (1, Di+1_pad)       f32
      o_ref : (tile_n, DL_pad)    bf16
    """
    n_layers = len(activations)
    x_ref = refs[0]
    o_ref = refs[1 + 2 * n_layers]

    h = x_ref[...]                                            # bf16 operand
    for i in range(n_layers):
        w_ref = refs[1 + 2 * i]
        b_ref = refs[2 + 2 * i]
        # bf16 x bf16 -> f32 accumulate on the MXU (matches torch.mm(h, W) + b).
        scores = (
            jnp.dot(h, w_ref[...], preferred_element_type=jnp.float32)
            + b_ref[...]
        )
        act = activations[i]
        if act == "relu":
            h_f32 = jnp.maximum(scores, 0.0)
        elif act == "softmax":
            # Row-wise softmax (torch.softmax(scores, dim=1)).  Padded logits
            # carry a -1e30 bias so exp() underflows to 0 and they do not
            # pollute the denominator.  Exact reciprocal: one per row, free.
            m = jnp.max(scores, axis=-1, keepdims=True)
            e = jnp.exp(scores - m)
            denom = jnp.sum(e, axis=-1, keepdims=True)
            h_f32 = e * pl.reciprocal(denom, approx=False)
        else:  # identity / linear
            h_f32 = scores

        if i + 1 < n_layers:
            h = h_f32.astype(jnp.bfloat16)                    # next MXU operand
        else:
            o_ref[...] = h_f32.astype(o_ref.dtype)            # bf16 writeback


class PTDeepPallas:
    """Pallas equivalent of PTDeep.forward (inference only).

    Activations are strings: "relu", "softmax", "identity" (the PyTorch module
    takes callables; torch.relu / torch.softmax map 1:1).
    """

    def __init__(self, dimensions, activations, key):
        assert len(activations) == len(dimensions) - 1
        self.dimensions = list(dimensions)
        self.activations = list(activations)

        # np.random.randn equivalents (deterministic standard normal), f32.
        self.weights, self.biases = [], []
        for i in range(len(dimensions) - 1):
            d_in, d_out = dimensions[i], dimensions[i + 1]
            key, kw, kb = jax.random.split(key, 3)
            self.weights.append(
                jax.random.normal(kw, (d_in, d_out), dtype=jnp.float32))
            self.biases.append(
                jax.random.normal(kb, (1, d_out), dtype=jnp.float32))

        # Lane-padded kernel params: W zero-padded & cast to bf16; bias stays
        # f32 with the padded tail set to -1e30 for softmax layers.
        self._dims_pad = [_round_up(d, _LANE) for d in self.dimensions]
        self._w_pad, self._b_pad = [], []
        for i, (w, b) in enumerate(zip(self.weights, self.biases)):
            dp_in, dp_out = self._dims_pad[i], self._dims_pad[i + 1]
            wp = (jnp.zeros((dp_in, dp_out), jnp.float32)
                  .at[: w.shape[0], : w.shape[1]].set(w))
            fill = _NEG_BIG if self.activations[i] == "softmax" else 0.0
            bp = (jnp.full((1, dp_out), fill, jnp.float32)
                  .at[:, : b.shape[1]].set(b))
            self._w_pad.append(wp.astype(jnp.bfloat16))
            self._b_pad.append(bp)

        # Resident VMEM bytes assuming single buffering (W bf16; bias f32 rows
        # pad to 8 sublanes in VMEM).
        self._resident_bytes = sum(
            self._dims_pad[i] * self._dims_pad[i + 1] * 2
            + 8 * self._dims_pad[i + 1] * 4
            for i in range(len(self.activations)))

    def forward(self, x, tile_n: int = 512):
        N, d_in = x.shape
        assert d_in == self.dimensions[0]
        n_layers = len(self.activations)
        d_out = self.dimensions[-1]
        d0_pad, dl_pad = self._dims_pad[0], self._dims_pad[-1]
        max_dp = max(self._dims_pad)

        budget, cores = _tpu_budget_and_cores()

        # --- batch tiling: bounded padding + VMEM-aware tile shrink ----------
        n16 = _round_up(max(N, 1), _SUBLANE_BF16)
        target = max(_SUBLANE_BF16, min(_round_up(tile_n, _SUBLANE_BF16), n16))
        while True:
            n_blocks = max(1, _cdiv(n16, target))
            if cores > 1:
                # Balanced multiple-of-core-count block count for dual-TC
                # chips; single-TC chips keep one full tile (serial grid).
                n_blocks = _round_up(n_blocks, cores)
            tile = _round_up(_cdiv(n16, n_blocks), _SUBLANE_BF16)
            n_pad = tile * n_blocks
            # Streamed x/out tiles are double-buffered (bf16); h/scores temps f32.
            stream = 2 * tile * d0_pad * 2 + 2 * tile * dl_pad * 2
            live = 3 * tile * max_dp * 4
            need = self._resident_bytes + stream + live
            if need <= budget or target <= _SUBLANE_BF16:
                break
            target = max(_SUBLANE_BF16, _round_up(target // 2, _SUBLANE_BF16))
        grid = (n_blocks,)

        vmem_limit = int(min(budget, max(2 * need, 32 << 20)))

        # Zero-pad batch rows / feature lanes; cast to bf16 BEFORE the pad so
        # the wrapper-side padding pass moves half the bytes.
        x_p = (jnp.zeros((n_pad, d0_pad), jnp.bfloat16)
               .at[:N, :d_in].set(x.astype(jnp.bfloat16)))

        inputs = [x_p]
        for li in range(n_layers):
            inputs.append(self._w_pad[li])
            inputs.append(self._b_pad[li])

        # --- cost hint --------------------------------------------------------
        flops = sum(2 * n_pad * self._dims_pad[i] * self._dims_pad[i + 1]
                    for i in range(n_layers))
        transcendentals = sum(n_pad * self._dims_pad[i + 1]
                              for i in range(n_layers)
                              if self.activations[i] == "softmax")
        bytes_accessed = (x_p.size * 2
                          + sum(w.size * 2 for w in self._w_pad)
                          + sum(b.size * 4 for b in self._b_pad)
                          + n_pad * dl_pad * 2)
        cost = pl.CostEstimate(flops=flops, transcendentals=transcendentals,
                               bytes_accessed=bytes_accessed)

        def build(single_buffer_resident: bool):
            res_kwargs = ({"pipeline_mode": pl.Buffered(1)}
                          if single_buffer_resident else {})
            in_specs = [pl.BlockSpec((tile, d0_pad), lambda i: (i, 0))]
            for li in range(n_layers):
                dp_in, dp_out = self._dims_pad[li], self._dims_pad[li + 1]
                in_specs.append(
                    pl.BlockSpec((dp_in, dp_out), lambda i: (0, 0), **res_kwargs))
                in_specs.append(
                    pl.BlockSpec((1, dp_out), lambda i: (0, 0), **res_kwargs))
            out_spec = pl.BlockSpec((tile, dl_pad), lambda i: (i, 0))
            return pl.pallas_call(
                functools.partial(_fused_mlp_kernel,
                                  activations=tuple(self.activations)),
                out_shape=jax.ShapeDtypeStruct((n_pad, dl_pad), jnp.bfloat16),
                grid=grid,
                in_specs=in_specs,
                out_specs=out_spec,
                compiler_params=pltpu.CompilerParams(
                    dimension_semantics=("parallel",),
                    vmem_limit_bytes=vmem_limit,
                ),
                cost_estimate=cost,
            )

        try:
            out = build(single_buffer_resident=True)(*inputs)
        except Exception:
            # Fallback for jax versions where pl.Buffered(1) (single-buffered
            # resident inputs) is not accepted: plain double-buffered specs.
            out = build(single_buffer_resident=False)(*inputs)

        # Tiny sliced result; cast back to f32 outside the kernel only.
        return out[:N, :d_out].astype(jnp.float32)


def _reference_forward(model: PTDeepPallas, x):
    """f32 reference emulating the kernel's bf16-in / f32-accumulate matmuls."""
    h = x
    for w, b, act in zip(model.weights, model.biases, model.activations):
        hb = h.astype(jnp.bfloat16).astype(jnp.float32)
        wb = w.astype(jnp.bfloat16).astype(jnp.float32)
        s = hb @ wb + b
        if act == "relu":
            h = jnp.maximum(s, 0.0)
        elif act == "softmax":
            h = jax.nn.softmax(s, axis=1)
        else:
            h = s
    return h


if __name__ == "__main__":
    key = jax.random.PRNGKey(0)
    key, kx = jax.random.split(key)

    # Small synthetic setup: 3 layers, hidden ReLU, final softmax (the standard
    # PTDeep classification use).  N=30 is deliberately not a tile multiple so
    # the row-padding path is exercised.
    dims = [16, 48, 32, 10]
    acts = ["relu", "relu", "softmax"]
    N = 30

    model = PTDeepPallas(dims, acts, key)
    x = jax.random.normal(kx, (N, dims[0]), dtype=jnp.float32)

    out = jax.block_until_ready(model.forward(x))
    ref = _reference_forward(model, x)

    assert out.shape == (N, dims[-1])
    assert bool(jnp.all(jnp.isfinite(out)))
    # softmax rows must sum to ~1 (bf16 output rounding tolerance)
    assert bool(jnp.allclose(jnp.sum(out, axis=1), 1.0, atol=1e-2))
    assert bool(jnp.allclose(out, ref, atol=1e-2, rtol=1e-2))

    print("KERNEL_OK")
</pallas_src>

<mosaic_0001>
module attributes {stable_mosaic.version = 11 : i64} {
  func.func @_fused_mlp_kernel(%arg0: i32, %arg1: memref<32x128xbf16, #tpu.memory_space<vmem>>, %arg2: memref<128x128xbf16, #tpu.memory_space<vmem>>, %arg3: memref<1x128xf32, #tpu.memory_space<vmem>>, %arg4: memref<128x128xbf16, #tpu.memory_space<vmem>>, %arg5: memref<1x128xf32, #tpu.memory_space<vmem>>, %arg6: memref<128x128xbf16, #tpu.memory_space<vmem>>, %arg7: memref<1x128xf32, #tpu.memory_space<vmem>>, %arg8: memref<32x128xbf16, #tpu.memory_space<vmem>>) attributes {dimension_semantics = [#tpu.dimension_semantics<parallel>], iteration_bounds = array<i64: 1>, scalar_prefetch = 0 : i64, scratch_operands = 0 : i64, tpu.core_type = #tpu.core_type<tc>, window_params = [{transform_indices = @transform_0, window_bounds = array<i64: 32, 128>}, {pipeline_mode = #tpu.pipeline_mode<synchronous>, transform_indices = @transform_1, window_bounds = array<i64: 128, 128>}, {pipeline_mode = #tpu.pipeline_mode<synchronous>, transform_indices = @transform_2, window_bounds = array<i64: 1, 128>}, {pipeline_mode = #tpu.pipeline_mode<synchronous>, transform_indices = @transform_3, window_bounds = array<i64: 128, 128>}, {pipeline_mode = #tpu.pipeline_mode<synchronous>, transform_indices = @transform_4, window_bounds = array<i64: 1, 128>}, {pipeline_mode = #tpu.pipeline_mode<synchronous>, transform_indices = @transform_5, window_bounds = array<i64: 128, 128>}, {pipeline_mode = #tpu.pipeline_mode<synchronous>, transform_indices = @transform_6, window_bounds = array<i64: 1, 128>}, {transform_indices = @transform_7, window_bounds = array<i64: 32, 128>}]} {
    %c0 = arith.constant 0 : index
    %c0_0 = arith.constant 0 : index
    %0 = vector.load %arg1[%c0, %c0_0] : memref<32x128xbf16, #tpu.memory_space<vmem>>, vector<32x128xbf16>
    %c0_1 = arith.constant 0 : index
    %c0_2 = arith.constant 0 : index
    %1 = vector.load %arg2[%c0_1, %c0_2] : memref<128x128xbf16, #tpu.memory_space<vmem>>, vector<128x128xbf16>
    %cst = arith.constant dense<0.000000e+00> : vector<32x128xf32>
    %2 = tpu.matmul %0, %1, %cst {dimension_numbers = #tpu.dot_dimension_numbers<[1], [0], [0], [1], [0, 0, 1, 1], [], []>} : vector<32x128xbf16>, vector<128x128xbf16>, vector<32x128xf32> -> vector<32x128xf32>
    %c0_3 = arith.constant 0 : index
    %c0_4 = arith.constant 0 : index
    %3 = vector.load %arg3[%c0_3, %c0_4] : memref<1x128xf32, #tpu.memory_space<vmem>>, vector<1x128xf32>
    %4 = vector.broadcast %3 : vector<1x128xf32> to vector<32x128xf32>
    %5 = arith.addf %2, %4 : vector<32x128xf32>
    %cst_5 = arith.constant 0.000000e+00 : f32
    %6 = vector.broadcast %cst_5 : f32 to vector<32x128xf32>
    %7 = arith.maximumf %5, %6 : vector<32x128xf32>
    %8 = arith.truncf %7 : vector<32x128xf32> to vector<32x128xbf16>
    %c0_6 = arith.constant 0 : index
    %c0_7 = arith.constant 0 : index
    %9 = vector.load %arg4[%c0_6, %c0_7] : memref<128x128xbf16, #tpu.memory_space<vmem>>, vector<128x128xbf16>
    %cst_8 = arith.constant dense<0.000000e+00> : vector<32x128xf32>
    %10 = tpu.matmul %8, %9, %cst_8 {dimension_numbers = #tpu.dot_dimension_numbers<[1], [0], [0], [1], [0, 0, 1, 1], [], []>} : vector<32x128xbf16>, vector<128x128xbf16>, vector<32x128xf32> -> vector<32x128xf32>
    %c0_9 = arith.constant 0 : index
    %c0_10 = arith.constant 0 : index
    %11 = vector.load %arg5[%c0_9, %c0_10] : memref<1x128xf32, #tpu.memory_space<vmem>>, vector<1x128xf32>
    %12 = vector.broadcast %11 : vector<1x128xf32> to vector<32x128xf32>
    %13 = arith.addf %10, %12 : vector<32x128xf32>
    %cst_11 = arith.constant 0.000000e+00 : f32
    %14 = vector.broadcast %cst_11 : f32 to vector<32x128xf32>
    %15 = arith.maximumf %13, %14 : vector<32x128xf32>
    %16 = arith.truncf %15 : vector<32x128xf32> to vector<32x128xbf16>
    %c0_12 = arith.constant 0 : index
    %c0_13 = arith.constant 0 : index
    %17 = vector.load %arg6[%c0_12, %c0_13] : memref<128x128xbf16, #tpu.memory_space<vmem>>, vector<128x128xbf16>
    %cst_14 = arith.constant dense<0.000000e+00> : vector<32x128xf32>
    %18 = tpu.matmul %16, %17, %cst_14 {dimension_numbers = #tpu.dot_dimension_numbers<[1], [0], [0], [1], [0, 0, 1, 1], [], []>} : vector<32x128xbf16>, vector<128x128xbf16>, vector<32x128xf32> -> vector<32x128xf32>
    %c0_15 = arith.constant 0 : index
    %c0_16 = arith.constant 0 : index
    %19 = vector.load %arg7[%c0_15, %c0_16] : memref<1x128xf32, #tpu.memory_space<vmem>>, vector<1x128xf32>
    %20 = vector.broadcast %19 : vector<1x128xf32> to vector<32x128xf32>
    %21 = arith.addf %18, %20 : vector<32x128xf32>
    %cst_17 = arith.constant dense<0xFF800000> : vector<32xf32>
    %22 = vector.multi_reduction <maximumf>, %21, %cst_17 [1] : vector<32x128xf32> to vector<32xf32>
    %23 = vector.shape_cast %22 : vector<32xf32> to vector<32x1xf32>
    %24 = vector.broadcast %23 : vector<32x1xf32> to vector<32x128xf32>
    %25 = arith.subf %21, %24 : vector<32x128xf32>
    %26 = math.exp %25 : vector<32x128xf32>
    %cst_18 = arith.constant dense<0.000000e+00> : vector<32xf32>
    %27 = vector.multi_reduction <add>, %26, %cst_18 [1] : vector<32x128xf32> to vector<32xf32>
    %28 = vector.shape_cast %27 : vector<32xf32> to vector<32x1xf32>
    %29 = tpu.reciprocal %28 : vector<32x1xf32> -> vector<32x1xf32>
    %30 = vector.broadcast %29 : vector<32x1xf32> to vector<32x128xf32>
    %31 = arith.mulf %26, %30 : vector<32x128xf32>
    %32 = arith.truncf %31 : vector<32x128xf32> to vector<32x128xbf16>
    %c0_19 = arith.constant 0 : index
    %c0_20 = arith.constant 0 : index
    %33 = vector.load %arg8[%c0_19, %c0_20] : memref<32x128xbf16, #tpu.memory_space<vmem>>, vector<32x128xbf16>
    tpu.vector_store %arg8[%c0_19, %c0_20], %32 {strides = array<i32>} : memref<32x128xbf16, #tpu.memory_space<vmem>>, vector<32x128xbf16>,
    return
  }
  func.func @transform_0(%arg0: i32) -> (i32, i32) {
    %c0_i32 = arith.constant 0 : i32
    %c0_i32_0 = arith.constant 0 : i32
    return %arg0, %c0_i32 : i32, i32
  }
  func.func @transform_1(%arg0: i32) -> (i32, i32) {
    %c0_i32 = arith.constant 0 : i32
    %c0_i32_0 = arith.constant 0 : i32
    %c0_i32_1 = arith.constant 0 : i32
    return %c0_i32, %c0_i32_0 : i32, i32
  }
  func.func @transform_2(%arg0: i32) -> (i32, i32) {
    %c0_i32 = arith.constant 0 : i32
    %c0_i32_0 = arith.constant 0 : i32
    %c0_i32_1 = arith.constant 0 : i32
    return %c0_i32, %c0_i32_0 : i32, i32
  }
  func.func @transform_3(%arg0: i32) -> (i32, i32) {
    %c0_i32 = arith.constant 0 : i32
    %c0_i32_0 = arith.constant 0 : i32
    %c0_i32_1 = arith.constant 0 : i32
    return %c0_i32, %c0_i32_0 : i32, i32
  }
  func.func @transform_4(%arg0: i32) -> (i32, i32) {
    %c0_i32 = arith.constant 0 : i32
    %c0_i32_0 = arith.constant 0 : i32
    %c0_i32_1 = arith.constant 0 : i32
    return %c0_i32, %c0_i32_0 : i32, i32
  }
  func.func @transform_5(%arg0: i32) -> (i32, i32) {
    %c0_i32 = arith.constant 0 : i32
    %c0_i32_0 = arith.constant 0 : i32
    %c0_i32_1 = arith.constant 0 : i32
    return %c0_i32, %c0_i32_0 : i32, i32
  }
  func.func @transform_6(%arg0: i32) -> (i32, i32) {
    %c0_i32 = arith.constant 0 : i32
    %c0_i32_0 = arith.constant 0 : i32
    %c0_i32_1 = arith.constant 0 : i32
    return %c0_i32, %c0_i32_0 : i32, i32
  }
  func.func @transform_7(%arg0: i32) -> (i32, i32) {
    %c0_i32 = arith.constant 0 : i32
    %c0_i32_0 = arith.constant 0 : i32
    return %arg0, %c0_i32 : i32, i32
  }
}

module attributes {stable_mosaic.version = 11 : i64} {
  func.func @_fused_mlp_kernel(%arg0: i32, %arg1: memref<32x128xbf16, #tpu.memory_space<vmem>>, %arg2: memref<128x128xbf16, #tpu.memory_space<vmem>>, %arg3: memref<1x128xf32, #tpu.memory_space<vmem>>, %arg4: memref<128x128xbf16, #tpu.memory_space<vmem>>, %arg5: memref<1x128xf32, #tpu.memory_space<vmem>>, %arg6: memref<128x128xbf16, #tpu.memory_space<vmem>>, %arg7: memref<1x128xf32, #tpu.memory_space<vmem>>, %arg8: memref<32x128xbf16, #tpu.memory_space<vmem>>) attributes {dimension_semantics = [#tpu.dimension_semantics<parallel>], iteration_bounds = array<i64: 1>, scalar_prefetch = 0 : i64, scratch_operands = 0 : i64, tpu.core_type = #tpu.core_type<tc>, window_params = [{transform_indices = @transform_0, window_bounds = array<i64: 32, 128>}, {pipeline_mode = #tpu.pipeline_mode<synchronous>, transform_indices = @transform_1, window_bounds = array<i64: 128, 128>}, {pipeline_mode = #tpu.pipeline_mode<synchronous>, transform_indices = @transform_2, window_bounds = array<i64: 1, 128>}, {pipeline_mode = #tpu.pipeline_mode<synchronous>, transform_indices = @transform_3, window_bounds = array<i64: 128, 128>}, {pipeline_mode = #tpu.pipeline_mode<synchronous>, transform_indices = @transform_4, window_bounds = array<i64: 1, 128>}, {pipeline_mode = #tpu.pipeline_mode<synchronous>, transform_indices = @transform_5, window_bounds = array<i64: 128, 128>}, {pipeline_mode = #tpu.pipeline_mode<synchronous>, transform_indices = @transform_6, window_bounds = array<i64: 1, 128>}, {transform_indices = @transform_7, window_bounds = array<i64: 32, 128>}]} {
    %c0 = arith.constant 0 : index
    %c0_0 = arith.constant 0 : index
    %0 = vector.load %arg1[%c0, %c0_0] : memref<32x128xbf16, #tpu.memory_space<vmem>>, vector<32x128xbf16>
    %c0_1 = arith.constant 0 : index
    %c0_2 = arith.constant 0 : index
    %1 = vector.load %arg2[%c0_1, %c0_2] : memref<128x128xbf16, #tpu.memory_space<vmem>>, vector<128x128xbf16>
    %cst = arith.constant dense<0.000000e+00> : vector<32x128xf32>
    %2 = tpu.matmul %0, %1, %cst {dimension_numbers = #tpu.dot_dimension_numbers<[1], [0], [0], [1], [0, 0, 1, 1], [], []>} : vector<32x128xbf16>, vector<128x128xbf16>, vector<32x128xf32> -> vector<32x128xf32>
    %c0_3 = arith.constant 0 : index
    %c0_4 = arith.constant 0 : index
    %3 = vector.load %arg3[%c0_3, %c0_4] : memref<1x128xf32, #tpu.memory_space<vmem>>, vector<1x128xf32>
    %4 = vector.broadcast %3 : vector<1x128xf32> to vector<32x128xf32>
    %5 = arith.addf %2, %4 : vector<32x128xf32>
    %cst_5 = arith.constant 0.000000e+00 : f32
    %6 = vector.broadcast %cst_5 : f32 to vector<32x128xf32>
    %7 = arith.maximumf %5, %6 : vector<32x128xf32>
    %8 = arith.truncf %7 : vector<32x128xf32> to vector<32x128xbf16>
    %c0_6 = arith.constant 0 : index
    %c0_7 = arith.constant 0 : index
    %9 = vector.load %arg4[%c0_6, %c0_7] : memref<128x128xbf16, #tpu.memory_space<vmem>>, vector<128x128xbf16>
    %cst_8 = arith.constant dense<0.000000e+00> : vector<32x128xf32>
    %10 = tpu.matmul %8, %9, %cst_8 {dimension_numbers = #tpu.dot_dimension_numbers<[1], [0], [0], [1], [0, 0, 1, 1], [], []>} : vector<32x128xbf16>, vector<128x128xbf16>, vector<32x128xf32> -> vector<32x128xf32>
    %c0_9 = arith.constant 0 : index
    %c0_10 = arith.constant 0 : index
    %11 = vector.load %arg5[%c0_9, %c0_10] : memref<1x128xf32, #tpu.memory_space<vmem>>, vector<1x128xf32>
    %12 = vector.broadcast %11 : vector<1x128xf32> to vector<32x128xf32>
    %13 = arith.addf %10, %12 : vector<32x128xf32>
    %cst_11 = arith.constant 0.000000e+00 : f32
    %14 = vector.broadcast %cst_11 : f32 to vector<32x128xf32>
    %15 = arith.maximumf %13, %14 : vector<32x128xf32>
    %16 = arith.truncf %15 : vector<32x128xf32> to vector<32x128xbf16>
    %c0_12 = arith.constant 0 : index
    %c0_13 = arith.constant 0 : index
    %17 = vector.load %arg6[%c0_12, %c0_13] : memref<128x128xbf16, #tpu.memory_space<vmem>>, vector<128x128xbf16>
    %cst_14 = arith.constant dense<0.000000e+00> : vector<32x128xf32>
    %18 = tpu.matmul %16, %17, %cst_14 {dimension_numbers = #tpu.dot_dimension_numbers<[1], [0], [0], [1], [0, 0, 1, 1], [], []>} : vector<32x128xbf16>, vector<128x128xbf16>, vector<32x128xf32> -> vector<32x128xf32>
    %c0_15 = arith.constant 0 : index
    %c0_16 = arith.constant 0 : index
    %19 = vector.load %arg7[%c0_15, %c0_16] : memref<1x128xf32, #tpu.memory_space<vmem>>, vector<1x128xf32>
    %20 = vector.broadcast %19 : vector<1x128xf32> to vector<32x128xf32>
    %21 = arith.addf %18, %20 : vector<32x128xf32>
    %cst_17 = arith.constant dense<0xFF800000> : vector<32xf32>
    %22 = vector.multi_reduction <maximumf>, %21, %cst_17 [1] : vector<32x128xf32> to vector<32xf32>
    %23 = vector.shape_cast %22 : vector<32xf32> to vector<32x1xf32>
    %24 = vector.broadcast %23 : vector<32x1xf32> to vector<32x128xf32>
    %25 = arith.subf %21, %24 : vector<32x128xf32>
    %26 = math.exp %25 : vector<32x128xf32>
    %cst_18 = arith.constant dense<0.000000e+00> : vector<32xf32>
    %27 = vector.multi_reduction <add>, %26, %cst_18 [1] : vector<32x128xf32> to vector<32xf32>
    %28 = vector.shape_cast %27 : vector<32xf32> to vector<32x1xf32>
    %29 = tpu.reciprocal %28 : vector<32x1xf32> -> vector<32x1xf32>
    %30 = vector.broadcast %29 : vector<32x1xf32> to vector<32x128xf32>
    %31 = arith.mulf %26, %30 : vector<32x128xf32>
    %32 = arith.truncf %31 : vector<32x128xf32> to vector<32x128xbf16>
    %c0_19 = arith.constant 0 : index
    %c0_20 = arith.constant 0 : index
    %33 = vector.load %arg8[%c0_19, %c0_20] : memref<32x128xbf16, #tpu.memory_space<vmem>>, vector<32x128xbf16>
    tpu.vector_store %arg8[%c0_19, %c0_20], %32 {strides = array<i32>} : memref<32x128xbf16, #tpu.memory_space<vmem>>, vector<32x128xbf16>,
    return
  }
  func.func @transform_0(%arg0: i32) -> (i32, i32) {
    %c0_i32 = arith.constant 0 : i32
    %c0_i32_0 = arith.constant 0 : i32
    return %arg0, %c0_i32 : i32, i32
  }
  func.func @transform_1(%arg0: i32) -> (i32, i32) {
    %c0_i32 = arith.constant 0 : i32
    %c0_i32_0 = arith.constant 0 : i32
    %c0_i32_1 = arith.constant 0 : i32
    return %c0_i32, %c0_i32_0 : i32, i32
  }
  func.func @transform_2(%arg0: i32) -> (i32, i32) {
    %c0_i32 = arith.constant 0 : i32
    %c0_i32_0 = arith.constant 0 : i32
    %c0_i32_1 = arith.constant 0 : i32
    return %c0_i32, %c0_i32_0 : i32, i32
  }
  func.func @transform_3(%arg0: i32) -> (i32, i32) {
    %c0_i32 = arith.constant 0 : i32
    %c0_i32_0 = arith.constant 0 : i32
    %c0_i32_1 = arith.constant 0 : i32
    return %c0_i32, %c0_i32_0 : i32, i32
  }
  func.func @transform_4(%arg0: i32) -> (i32, i32) {
    %c0_i32 = arith.constant 0 : i32
    %c0_i32_0 = arith.constant 0 : i32
    %c0_i32_1 = arith.constant 0 : i32
    return %c0_i32, %c0_i32_0 : i32, i32
  }
  func.func @transform_5(%arg0: i32) -> (i32, i32) {
    %c0_i32 = arith.constant 0 : i32
    %c0_i32_0 = arith.constant 0 : i32
    %c0_i32_1 = arith.constant 0 : i32
    return %c0_i32, %c0_i32_0 : i32, i32
  }
  func.func @transform_6(%arg0: i32) -> (i32, i32) {
    %c0_i32 = arith.constant 0 : i32
    %c0_i32_0 = arith.constant 0 : i32
    %c0_i32_1 = arith.constant 0 : i32
    return %c0_i32, %c0_i32_0 : i32, i32
  }
  func.func @transform_7(%arg0: i32) -> (i32, i32) {
    %c0_i32 = arith.constant 0 : i32
    %c0_i32_0 = arith.constant 0 : i32
    return %arg0, %c0_i32 : i32, i32
  }
}

</mosaic_0001>

<bundles_post_ra>
// kernel: tpu_custom_call.1
= control target key start
LH: loop header
LB: loop body
LE: loop exit
PB: predicated region body
PF: predicated region fallthrough
CT: control target
= control target key end

     0   :  { %12 = vsyncpa [#allocation3], 0  ;;  %s893_s0 = inlined_call_operand.hbm [shape: bf16[32,128], index: 0, kind: input, shape index: {}]   ;;  %s894_s1 = inlined_call_operand.hbm [shape: bf16[128,128], index: 1, kind: input, shape index: {}]   ;;  %s895_s2 = inlined_call_operand.vmem [shape: f32[1,128], index: 2, kind: input, shape index: {}]   ;;  %s896_s3 = inlined_call_operand.hbm [shape: bf16[128,128], index: 3, kind: input, shape index: {}]   ;;  %s897_s4 = inlined_call_operand.vmem [shape: f32[1,128], index: 4, kind: input, shape index: {}]   ;;  %s898_s5 = inlined_call_operand.hbm [shape: bf16[128,128], index: 5, kind: input, shape index: {}]   ;;  %s899_s6 = inlined_call_operand.vmem [shape: f32[1,128], index: 6, kind: input, shape index: {}]   ;;  %s900_s7 = inlined_call_operand.hbm [shape: bf16[32,128], index: 7, kind: output, shape index: {}]  }
   0x1   :  { %13 = vsyncpa [#allocation6], 0 }
   0x2   :  { %14 = vsyncpa [#allocation9], 0 }
   0x3   :  { %15 = vsyncpa [#allocation4], 0  ;;  %s33_s26 = sshll.u32 %s894_s1, 4  ;;  %s799_s27 = smov [#allocation5]   ;;  %s34_s26 = int_to_ptr.hbm [resolvable:$true] %s33_s26 }
   0x4   :  { %s35_s28 = sshll.u32 %s799_s27, 4  ;;  %s20_s8 = sshll.u32 %s893_s0, 4  ;;  %s36_s28 = int_to_ptr.vmem [resolvable:$true] %s35_s28  ;;  %s21_s8 = int_to_ptr.hbm [resolvable:$true] %s20_s8 }
   0x5   :  { %s800_s9 = smov 64   ;;  %s801_s10 = smov 4  }
   0x6   :  { %41 = dma.hbm_to_vmem [thread:$0]  %s34_s26, 1024, %s36_s28, [#allocation6], %s800_s9, %s800_s9, %s801_s10  }
   0x7   :  { %s802_s11 = smov [#allocation2]   ;;  %s48_s1 = sshll.u32 %s896_s3, 4  ;;  %s49_s1 = int_to_ptr.hbm [resolvable:$true] %s48_s1 }
   0x8   :  { %s22_s12 = sshll.u32 %s802_s11, 4  ;;  %s63_s16 = sshll.u32 %s898_s5, 4  ;;  %s23_s12 = int_to_ptr.vmem [resolvable:$true] %s22_s12  ;;  %s64_s16 = int_to_ptr.hbm [resolvable:$true] %s63_s16 }
   0x9   :  { %28 = dma.hbm_to_vmem [thread:$0]  %s21_s8, 256, %s23_s12, [#allocation3], %s800_s9, %s800_s9, %s801_s10  }
   0xa   :  { %s803_s17 = smov [#allocation7]   ;;  %s804_s19 = smov [#allocation8]  }
   0xb   :  { %s50_s18 = sshll.u32 %s803_s17, 4  ;;  %s65_s3 = sshll.u32 %s804_s19, 4  ;;  %s51_s18 = int_to_ptr.vmem [resolvable:$true] %s50_s18  ;;  %s66_s3 = int_to_ptr.vmem [resolvable:$true] %s65_s3 }
   0xc   :  { %56 = dma.hbm_to_vmem [thread:$0]  %s49_s1, 1024, %s51_s18, [#allocation6], %s800_s9, %s800_s9, %s801_s10  }
   0xd   :  { %71 = dma.hbm_to_vmem [thread:$0]  %s64_s16, 1024, %s66_s3, [#allocation9], %s800_s9, %s800_s9, %s801_s10  }
   0xe   :  { %791 = dma.done.wait [#allocation3], 256  }
   0xf   :  { %792 = vsyncadd [#allocation3], 4294967040 }
  0x10   :  { %793 = dma.done.wait [#allocation6], 2048  }
  0x11   :  { %794 = vsyncadd [#allocation6], 4294965248 }
  0x12   :  { %795 = dma.done.wait [#allocation9], 1024  }
  0x13   :  { %796 = vsyncadd [#allocation9], 4294966272  ;;  %v609_v0 = vld [vmem:[#allocation5 + $0x38] sm:$0xff]  ;;  %v608_v1 = vld [vmem:[#allocation5 + $0x30] sm:$0xff]  ;;  %s481_s26 = sshll.u32 %s900_s7, 4  ;;  %s482_s26 = int_to_ptr.hbm [resolvable:$true] %s481_s26 }
  0x14   :  { %174 = vmatpush.bf16.msra.mxu0 %v609_v0  ;;  %637 = vmatpush.bf16.msra.mxu3 %v609_v0  ;;  %v617_v2 = vld [vmem:[#allocation7 + $0x38] sm:$0xff]  ;;  %v616_v3 = vld [vmem:[#allocation7 + $0x30] sm:$0xff]  ;;  %v607_v4 = vld [vmem:[#allocation5 + $0x28] sm:$0xff] }
  0x15   :  { %267 = vmatpush.bf16.msra.mxu1 %v617_v2  ;;  %v615_v5 = vld [vmem:[#allocation7 + $0x28] sm:$0xff]  ;;  %v606_v6 = vld [vmem:[#allocation5 + $0x20] sm:$0xff]  ;;  %v605_v8 = vld [vmem:[#allocation5 + $0x18] sm:$0xff] }
  0x16   :  { %v614_v7 = vld [vmem:[#allocation7 + $0x20] sm:$0xff]  ;;  %v604_v9 = vld [vmem:[#allocation5 + $0x10] sm:$0xff]  ;;  %v603_v10 = vld [vmem:[#allocation5 + $0x8] sm:$0xff] }
  0x17   :  { %v602_v11 = vld [vmem:[#allocation5] sm:$0xff]  ;;  %v600_v12 = vld [vmem:[#allocation2] sm:$0xff]  ;;  %v601_v13 = vld [vmem:[#allocation2 + $0x8] sm:$0xff] }
  0x18   :  { %175 = vmatpush.bf16.msra.mxu0 %v608_v1  ;;  %638 = vmatpush.bf16.msra.mxu3 %v608_v1  ;;  %v613_v14 = vld [vmem:[#allocation7 + $0x18] sm:$0xff]  ;;  %v612_v15 = vld [vmem:[#allocation7 + $0x10] sm:$0xff]  ;;  %v611_v16 = vld [vmem:[#allocation7 + $0x8] sm:$0xff] }
  0x19   :  { %268 = vmatpush.bf16.msra.mxu1 %v616_v3  ;;  %v610_v17 = vld [vmem:[#allocation7] sm:$0xff]  ;;  %v625_v18 = vld [vmem:[#allocation8 + $0x38] sm:$0xff]  ;;  %v624_v20 = vld [vmem:[#allocation8 + $0x30] sm:$0xff] }
  0x1a   :  { %360 = vmatpush.bf16.msra.mxu2 %v625_v18  ;;  %v652_v21 = vld [vmem:[%s895_s2] ss:$0 sm:$0xff]  ;;  %v623_v22 = vld [vmem:[#allocation8 + $0x28] sm:$0xff]  ;;  %v622_v27 = vld [vmem:[#allocation8 + $0x20] sm:$0xff] }
  0x1b   :  { %v621_v37 = vld [vmem:[#allocation8 + $0x18] sm:$0xff]  ;;  %v620_v38 = vld [vmem:[#allocation8 + $0x10] sm:$0xff]  ;;  %v619_v39 = vld [vmem:[#allocation8 + $0x8] sm:$0xff] }
  0x1c   :  { %176 = vmatpush.bf16.msra.mxu0 %v607_v4  ;;  %639 = vmatpush.bf16.msra.mxu3 %v607_v4  ;;  %v618_v40 = vld [vmem:[#allocation8] sm:$0xff]  ;;  %v653_v42 = vld [vmem:[%s897_s4] ss:$0 sm:$0xff]  ;;  %s805_s4 = smov [#allocation10]  }
  0x1d   :  { %269 = vmatpush.bf16.msra.mxu1 %v615_v5  ;;  %v654_v56 = vld [vmem:[%s899_s6] ss:$0 sm:$0xff]  ;;  %s479_s6 = sshll.u32 %s805_s4, 4  ;;  %s480_s6 = int_to_ptr.vmem [resolvable:$true] %s479_s6 }
  0x1e   :  { %361 = vmatpush.bf16.msra.mxu2 %v624_v20 }
  0x20   :  { %177 = vmatpush.bf16.msra.mxu0 %v606_v6  ;;  %640 = vmatpush.bf16.msra.mxu3 %v606_v6 }
  0x21   :  { %270 = vmatpush.bf16.msra.mxu1 %v614_v7 }
  0x22   :  { %362 = vmatpush.bf16.msra.mxu2 %v623_v22 }
  0x24   :  { %178 = vmatpush.bf16.msra.mxu0 %v605_v8  ;;  %641 = vmatpush.bf16.msra.mxu3 %v605_v8 }
  0x25   :  { %271 = vmatpush.bf16.msra.mxu1 %v613_v14 }
  0x26   :  { %363 = vmatpush.bf16.msra.mxu2 %v622_v27 }
  0x28   :  { %179 = vmatpush.bf16.msra.mxu0 %v604_v9  ;;  %642 = vmatpush.bf16.msra.mxu3 %v604_v9 }
  0x29   :  { %272 = vmatpush.bf16.msra.mxu1 %v612_v15 }
  0x2a   :  { %364 = vmatpush.bf16.msra.mxu2 %v621_v37 }
  0x2c   :  { %180 = vmatpush.bf16.msra.mxu0 %v603_v10  ;;  %643 = vmatpush.bf16.msra.mxu3 %v603_v10 }
  0x2d   :  { %273 = vmatpush.bf16.msra.mxu1 %v611_v16 }
  0x2e   :  { %365 = vmatpush.bf16.msra.mxu2 %v620_v38 }
  0x30   :  { %181 = vmatpush.bf16.msra.mxu0 %v602_v11  ;;  %644 = vmatpush.bf16.msra.mxu3 %v602_v11 }
  0x31   :  { %274 = vmatpush.bf16.msra.mxu1 %v610_v17 }
  0x32   :  { %366 = vmatpush.bf16.msra.mxu2 %v619_v39 }
  0x33   :  { %182 = vmatmul.bf16.vlgmr.msra.gmra.mxu0 %v600_v12  ;;  %187 = vmatmul.bf16.vlgmr.msra.gmra.mxu3 %v601_v13 }
  0x36   :  { %367 = vmatpush.bf16.msra.mxu2 %v618_v40 }
  0xb0   :  { %v183_v19 = vpop.f32.mrf.mxu0 }
  0xb1   :  { %v184_v23 = vadd.f32 %v652_v21, %v183_v19 }
  0xb3   :  { %v193_v28 = vmax.f32 %v184_v23, 0.0 }
  0xb6   :  { %v188_v25 = vpop.f32.mrf.mxu3 }
  0xb7   :  { %v189_v32 = vadd.f32 %v652_v21, %v188_v25 }
  0xb8   :  { %v185_v24 = vpop.f32.mrf.mxu0 }
  0xb9   :  { %v186_v26 = vadd.f32 %v652_v21, %v185_v24  ;;  %v195_v34 = vmax.f32 %v189_v32, 0.0 }
  0xbb   :  { %v194_v29 = vmax.f32 %v186_v26, 0.0 }
  0xbd   :  { %v197_v30 = vpack.c.bf16 %v194_v29, %v193_v28 }
  0xbe   :  { %v190_v31 = vpop.f32.mrf.mxu3 }
  0xbf   :  { %275 = vmatmul.bf16.vlgmr.msra.gmra.mxu1 %v197_v30  ;;  %v191_v33 = vadd.f32 %v652_v21, %v190_v31 }
  0xc1   :  { %v196_v35 = vmax.f32 %v191_v33, 0.0 }
  0xc3   :  { %v198_v36 = vpack.c.bf16 %v196_v35, %v195_v34 }
  0xcf   :  { %280 = vmatmul.bf16.gmra.mxu1 %v198_v36 }
 0x13c   :  { %v276_v41 = vpop.f32.mrf.mxu1 }
 0x13d   :  { %v277_v43 = vadd.f32 %v653_v42, %v276_v41 }
 0x13f   :  { %v286_v46 = vmax.f32 %v277_v43, 0.0 }
 0x144   :  { %v278_v44 = vpop.f32.mrf.mxu1 }
 0x145   :  { %v279_v45 = vadd.f32 %v653_v42, %v278_v44 }
 0x147   :  { %v287_v47 = vmax.f32 %v279_v45, 0.0 }
 0x149   :  { %v290_v48 = vpack.c.bf16 %v287_v47, %v286_v46 }
 0x14b   :  { %368 = vmatmul.bf16.vlgmr.msra.gmra.mxu2 %v290_v48 }
 0x14c   :  { %v281_v49 = vpop.f32.mrf.mxu1 }
 0x14d   :  { %v282_v50 = vadd.f32 %v653_v42, %v281_v49 }
 0x14f   :  { %v288_v53 = vmax.f32 %v282_v50, 0.0 }
 0x154   :  { %v283_v51 = vpop.f32.mrf.mxu1 }
 0x155   :  { %v284_v52 = vadd.f32 %v653_v42, %v283_v51 }
 0x157   :  { %v289_v54 = vmax.f32 %v284_v52, 0.0 }
 0x159   :  { %v291_v55 = vpack.c.bf16 %v289_v54, %v288_v53 }
 0x15b   :  { %373 = vmatmul.bf16.gmra.mxu2 %v291_v55 }
 0x1ce   :  { %v369_v57 = vpop.f32.mrf.mxu2 }
 0x1cf   :  { %v370_v58 = vadd.f32 %v654_v56, %v369_v57 }
 0x1d1   :  { %379 = vmax.xlane.f32.xlu0 %v370_v58 }
 0x1d6   :  { %v371_v59 = vpop.f32.mrf.mxu2 }
 0x1d7   :  { %v372_v60 = vadd.f32 %v654_v56, %v371_v59 }
 0x1d9   :  { %381 = vmax.xlane.f32.xlu0 %v372_v60 }
 0x1de   :  { %v374_v61 = vpop.f32.mrf.mxu2 }
 0x1df   :  { %v375_v62 = vadd.f32 %v654_v56, %v374_v61 }
 0x1e1   :  { %383 = vmax.xlane.f32.xlu1 %v375_v62 }
 0x1e6   :  { %v376_v63 = vpop.f32.mrf.mxu2 }
 0x1e7   :  { %v377_v0 = vadd.f32 %v654_v56, %v376_v63 }
 0x1e9   :  { %385 = vmax.xlane.f32.xlu1 %v377_v0 }
 0x244   :  { %v380_v1 = vpop.xlane.xlu0 %379 }
 0x245   :  { %v387_v2 = vsub.f32 %v370_v58, %v380_v1 }
 0x247   :  { %v391_v3 = vmul.f32 1.442695, %v387_v2 }
 0x249   :  { %655 = vpow2.f32 %v391_v3 }
 0x24c   :  { %v382_v4 = vpop.xlane.xlu0 %381 }
 0x24d   :  { %v388_v5 = vsub.f32 %v372_v60, %v382_v4 }
 0x24f   :  { %v656_v6 = vpop.eup %655  ;;  %v393_v7 = vmul.f32 1.442695, %v388_v5 }
 0x250   :  { %399 = vadd.xlane.f32.xlu2 %v656_v6 }
 0x251   :  { %657 = vpow2.f32 %v393_v7 }
 0x254   :  { %v384_v8 = vpop.xlane.xlu1 %383 }
 0x255   :  { %v389_v9 = vsub.f32 %v375_v62, %v384_v8 }
 0x257   :  { %v658_v10 = vpop.eup %657  ;;  %v395_v11 = vmul.f32 1.442695, %v389_v9 }
 0x258   :  { %401 = vadd.xlane.f32.xlu2 %v658_v10 }
 0x259   :  { %659 = vpow2.f32 %v395_v11 }
 0x25c   :  { %v386_v12 = vpop.xlane.xlu1 %385 }
 0x25d   :  { %v390_v13 = vsub.f32 %v377_v0, %v386_v12 }
 0x25f   :  { %v879_v14 = vpop.eup %659  ;;  %v397_v15 = vmul.f32 1.442695, %v390_v13 }
 0x260   :  { %403 = vadd.xlane.f32.xlu0 %v879_v14 }
 0x261   :  { %661 = vpow2.f32 %v397_v15 }
 0x267   :  { %v882_v16 = vpop.eup %661 }
 0x268   :  { %405 = vadd.xlane.f32.xlu1 %v882_v16 }
 0x2c3   :  { %v400_v17 = vpop.xlane.xlu2 %399 }
 0x2c4   :  { %663 = vrcp.f32 %v400_v17  ;;  %v418_v27 = vand.u32 2147483648, %v400_v17  ;;  %vm412_vm1 = vweird.f32 %v400_v17  ;;  %v416_v28 = vand.u32 2147483647, %v400_v17 }
 0x2c6   :  { %v419_v34 = vor.u32 1.1754944e-38, %v418_v27  ;;  %vm417_vm4 = vcmp.eq.f32.partialorder %v416_v28, 8.507059e+37 }
 0x2ca   :  { %v664_v18 = vpop.eup %663 }
 0x2cb   :  { %v408_v19 = vmul.f32 %v664_v18, %v400_v17  ;;  %v402_v20 = vpop.xlane.xlu2 %401  ;;  %vm413_vm0 = vweird.f32 %v664_v18 }
 0x2cc   :  { %665 = vrcp.f32 %v402_v20  ;;  %vm414_vm2 = vmor %vm412_vm1, %vm413_vm0  ;;  %v432_v30 = vand.u32 2147483648, %v402_v20  ;;  %v430_v33 = vand.u32 2147483647, %v402_v20  ;;  %vm426_vm5 = vweird.f32 %v402_v20 }
 0x2cd   :  { %v409_v21 = vsub.f32 1.0, %v408_v19 }
 0x2ce   :  { %v433_v37 = vor.u32 1.1754944e-38, %v432_v30  ;;  %vm431_vm7 = vcmp.eq.f32.partialorder %v430_v33, 8.507059e+37 }
 0x2cf   :  { %v410_v22 = vmul.f32 %v664_v18, %v409_v21 }
 0x2d1   :  { %v411_v24 = vadd.f32 %v664_v18, %v410_v22 }
 0x2d2   :  { %v666_v23 = vpop.eup %665 }
 0x2d3   :  { %v422_v25 = vmul.f32 %v666_v23, %v402_v20  ;;  %v404_v26 = vpop.xlane.xlu0 %403  ;;  %v415_v31 = vsel %vm414_vm2, %v664_v18, %v411_v24  ;;  %vm427_vm3 = vweird.f32 %v666_v23 }
 0x2d4   :  { %667 = vrcp.f32 %v404_v26  ;;  %vm428_vm6 = vmor %vm426_vm5, %vm427_vm3  ;;  %v420_v38 = vsel %vm417_vm4, %v419_v34, %v415_v31  ;;  %v446_v51 = vand.u32 2147483648, %v404_v26  ;;  %vm440_vm9 = vweird.f32 %v404_v26 }
 0x2d5   :  { %v423_v29 = vsub.f32 1.0, %v422_v25  ;;  %v463_v45 = vmul.f32 %v656_v6, %v420_v38  ;;  %v444_v52 = vand.u32 2147483647, %v404_v26 }
 0x2d6   :  { %v447_v58 = vor.u32 1.1754944e-38, %v446_v51 }
 0x2d7   :  { %v424_v32 = vmul.f32 %v666_v23, %v423_v29  ;;  %vm445_vm12 = vcmp.eq.f32.partialorder %v444_v52, 8.507059e+37 }
 0x2d9   :  { %v425_v35 = vadd.f32 %v666_v23, %v424_v32 }
 0x2da   :  { %v668_v36 = vpop.eup %667 }
 0x2db   :  { %v429_v39 = vsel %vm428_vm6, %v666_v23, %v425_v35  ;;  %v436_v40 = vmul.f32 %v668_v36, %v404_v26  ;;  %v406_v41 = vpop.xlane.xlu1 %405  ;;  %vm441_vm8 = vweird.f32 %v668_v36 }
 0x2dc   :  { %v434_v42 = vsel %vm431_vm7, %v433_v37, %v429_v39  ;;  %669 = vrcp.f32 %v406_v41  ;;  %vm442_vm10 = vmor %vm440_vm9, %vm441_vm8  ;;  %v460_v54 = vand.u32 2147483648, %v406_v41  ;;  %v458_v57 = vand.u32 2147483647, %v406_v41 }
 0x2dd   :  { %v464_v43 = vmul.f32 %v658_v10, %v434_v42  ;;  %v437_v44 = vsub.f32 1.0, %v436_v40  ;;  %vm454_vm13 = vweird.f32 %v406_v41 }
 0x2de   :  { %v461_v61 = vor.u32 1.1754944e-38, %v460_v54  ;;  %vm459_vm15 = vcmp.eq.f32.partialorder %v458_v57, 8.507059e+37 }
 0x2df   :  { %v438_v46 = vmul.f32 %v668_v36, %v437_v44  ;;  %v629_v47 = vpack.c.bf16 %v464_v43, %v463_v45 }
 0x2e1   :  { %630 = vst [vmem:[#allocation10] sm:$0xff] %v629_v47   ;;  %v439_v49 = vadd.f32 %v668_v36, %v438_v46 }
 0x2e2   :  { %v670_v48 = vpop.eup %669 }
 0x2e3   :  { %v450_v50 = vmul.f32 %v670_v48, %v406_v41  ;;  %v443_v55 = vsel %vm442_vm10, %v668_v36, %v439_v49  ;;  %vm455_vm11 = vweird.f32 %v670_v48 }
 0x2e4   :  { %v448_v60 = vsel %vm445_vm12, %v447_v58, %v443_v55  ;;  %vm456_vm14 = vmor %vm454_vm13, %vm455_vm11 }
 0x2e5   :  { %v451_v53 = vsub.f32 1.0, %v450_v50  ;;  %v465_v0 = vmul.f32 %v879_v14, %v448_v60 }
 0x2e7   :  { %v452_v56 = vmul.f32 %v670_v48, %v451_v53 }
 0x2e9   :  { %v453_v59 = vadd.f32 %v670_v48, %v452_v56 }
 0x2eb   :  { %v457_v62 = vsel %vm456_vm14, %v670_v48, %v453_v59 }
 0x2ec   :  { %v462_v63 = vsel %vm459_vm15, %v461_v61, %v457_v62 }
 0x2ed   :  { %v466_v1 = vmul.f32 %v882_v16, %v462_v63 }
 0x2ef   :  { %v634_v2 = vpack.c.bf16 %v466_v1, %v465_v0 }
 0x2f1   :  { %636 = vst [vmem:[#allocation10 + $0x8] sm:$0xff] %v634_v2  }
 0x2f2   :  { %487 = dma.vmem_to_hbm [thread:$0]  %s480_s6, 256, %s482_s26, [#allocation4], %s800_s9, %s800_s9, %s801_s10  }
 0x2f3   :  { %797 = dma.done.wait [#allocation4], 256  }
 0x2f4   :  { %798 = vsyncadd [#allocation4], 4294967040 }
 0x2f5   :  { %492 = vsyncpa [#allocation3], 1 }
 0x2f6   :  { %493 = vsyncpa [#allocation6], 1 }
 0x2f7   :  { %494 = vsyncpa [#allocation9], 1 }
 0x2f8   :  { %495 = vsyncpa [#allocation4], 1 }

// kernel: tpu_custom_call.1
= control target key start
LH: loop header
LB: loop body
LE: loop exit
PB: predicated region body
PF: predicated region fallthrough
CT: control target
= control target key end

     0   :  { %12 = vsyncpa [#allocation3], 0  ;;  %s893_s0 = inlined_call_operand.hbm [shape: bf16[32,128], index: 0, kind: input, shape index: {}]   ;;  %s894_s1 = inlined_call_operand.hbm [shape: bf16[128,128], index: 1, kind: input, shape index: {}]   ;;  %s895_s2 = inlined_call_operand.vmem [shape: f32[1,128], index: 2, kind: input, shape index: {}]   ;;  %s896_s3 = inlined_call_operand.hbm [shape: bf16[128,128], index: 3, kind: input, shape index: {}]   ;;  %s897_s4 = inlined_call_operand.vmem [shape: f32[1,128], index: 4, kind: input, shape index: {}]   ;;  %s898_s5 = inlined_call_operand.hbm [shape: bf16[128,128], index: 5, kind: input, shape index: {}]   ;;  %s899_s6 = inlined_call_operand.vmem [shape: f32[1,128], index: 6, kind: input, shape index: {}]   ;;  %s900_s7 = inlined_call_operand.hbm [shape: bf16[32,128], index: 7, kind: output, shape index: {}]  }
   0x1   :  { %13 = vsyncpa [#allocation6], 0 }
   0x2   :  { %14 = vsyncpa [#allocation9], 0 }
   0x3   :  { %15 = vsyncpa [#allocation4], 0  ;;  %s33_s26 = sshll.u32 %s894_s1, 4  ;;  %s799_s27 = smov [#allocation5]   ;;  %s34_s26 = int_to_ptr.hbm [resolvable:$true] %s33_s26 }
   0x4   :  { %s35_s28 = sshll.u32 %s799_s27, 4  ;;  %s20_s8 = sshll.u32 %s893_s0, 4  ;;  %s36_s28 = int_to_ptr.vmem [resolvable:$true] %s35_s28  ;;  %s21_s8 = int_to_ptr.hbm [resolvable:$true] %s20_s8 }
   0x5   :  { %s800_s9 = smov 64   ;;  %s801_s10 = smov 4  }
   0x6   :  { %41 = dma.hbm_to_vmem [thread:$0]  %s34_s26, 1024, %s36_s28, [#allocation6], %s800_s9, %s800_s9, %s801_s10  }
   0x7   :  { %s802_s11 = smov [#allocation2]   ;;  %s48_s1 = sshll.u32 %s896_s3, 4  ;;  %s49_s1 = int_to_ptr.hbm [resolvable:$true] %s48_s1 }
   0x8   :  { %s22_s12 = sshll.u32 %s802_s11, 4  ;;  %s63_s16 = sshll.u32 %s898_s5, 4  ;;  %s23_s12 = int_to_ptr.vmem [resolvable:$true] %s22_s12  ;;  %s64_s16 = int_to_ptr.hbm [resolvable:$true] %s63_s16 }
   0x9   :  { %28 = dma.hbm_to_vmem [thread:$0]  %s21_s8, 256, %s23_s12, [#allocation3], %s800_s9, %s800_s9, %s801_s10  }
   0xa   :  { %s803_s17 = smov [#allocation7]   ;;  %s804_s19 = smov [#allocation8]  }
   0xb   :  { %s50_s18 = sshll.u32 %s803_s17, 4  ;;  %s65_s3 = sshll.u32 %s804_s19, 4  ;;  %s51_s18 = int_to_ptr.vmem [resolvable:$true] %s50_s18  ;;  %s66_s3 = int_to_ptr.vmem [resolvable:$true] %s65_s3 }
   0xc   :  { %56 = dma.hbm_to_vmem [thread:$0]  %s49_s1, 1024, %s51_s18, [#allocation6], %s800_s9, %s800_s9, %s801_s10  }
   0xd   :  { %71 = dma.hbm_to_vmem [thread:$0]  %s64_s16, 1024, %s66_s3, [#allocation9], %s800_s9, %s800_s9, %s801_s10  }
   0xe   :  { %791 = dma.done.wait [#allocation3], 256  }
   0xf   :  { %792 = vsyncadd [#allocation3], 4294967040 }
  0x10   :  { %793 = dma.done.wait [#allocation6], 2048  }
  0x11   :  { %794 = vsyncadd [#allocation6], 4294965248 }
  0x12   :  { %795 = dma.done.wait [#allocation9], 1024  }
  0x13   :  { %796 = vsyncadd [#allocation9], 4294966272  ;;  %v609_v0 = vld [vmem:[#allocation5 + $0x38] sm:$0xff]  ;;  %v608_v1 = vld [vmem:[#allocation5 + $0x30] sm:$0xff]  ;;  %s481_s26 = sshll.u32 %s900_s7, 4  ;;  %s482_s26 = int_to_ptr.hbm [resolvable:$true] %s481_s26 }
  0x14   :  { %174 = vmatpush.bf16.msra.mxu0 %v609_v0  ;;  %637 = vmatpush.bf16.msra.mxu3 %v609_v0  ;;  %v617_v2 = vld [vmem:[#allocation7 + $0x38] sm:$0xff]  ;;  %v616_v3 = vld [vmem:[#allocation7 + $0x30] sm:$0xff]  ;;  %v607_v4 = vld [vmem:[#allocation5 + $0x28] sm:$0xff] }
  0x15   :  { %267 = vmatpush.bf16.msra.mxu1 %v617_v2  ;;  %v615_v5 = vld [vmem:[#allocation7 + $0x28] sm:$0xff]  ;;  %v606_v6 = vld [vmem:[#allocation5 + $0x20] sm:$0xff]  ;;  %v605_v8 = vld [vmem:[#allocation5 + $0x18] sm:$0xff] }
  0x16   :  { %v614_v7 = vld [vmem:[#allocation7 + $0x20] sm:$0xff]  ;;  %v604_v9 = vld [vmem:[#allocation5 + $0x10] sm:$0xff]  ;;  %v603_v10 = vld [vmem:[#allocation5 + $0x8] sm:$0xff] }
  0x17   :  { %v602_v11 = vld [vmem:[#allocation5] sm:$0xff]  ;;  %v600_v12 = vld [vmem:[#allocation2] sm:$0xff]  ;;  %v601_v13 = vld [vmem:[#allocation2 + $0x8] sm:$0xff] }
  0x18   :  { %175 = vmatpush.bf16.msra.mxu0 %v608_v1  ;;  %638 = vmatpush.bf16.msra.mxu3 %v608_v1  ;;  %v613_v14 = vld [vmem:[#allocation7 + $0x18] sm:$0xff]  ;;  %v612_v15 = vld [vmem:[#allocation7 + $0x10] sm:$0xff]  ;;  %v611_v16 = vld [vmem:[#allocation7 + $0x8] sm:$0xff] }
  0x19   :  { %268 = vmatpush.bf16.msra.mxu1 %v616_v3  ;;  %v610_v17 = vld [vmem:[#allocation7] sm:$0xff]  ;;  %v625_v18 = vld [vmem:[#allocation8 + $0x38] sm:$0xff]  ;;  %v624_v20 = vld [vmem:[#allocation8 + $0x30] sm:$0xff] }
  0x1a   :  { %360 = vmatpush.bf16.msra.mxu2 %v625_v18  ;;  %v652_v21 = vld [vmem:[%s895_s2] ss:$0 sm:$0xff]  ;;  %v623_v22 = vld [vmem:[#allocation8 + $0x28] sm:$0xff]  ;;  %v622_v27 = vld [vmem:[#allocation8 + $0x20] sm:$0xff] }
  0x1b   :  { %v621_v37 = vld [vmem:[#allocation8 + $0x18] sm:$0xff]  ;;  %v620_v38 = vld [vmem:[#allocation8 + $0x10] sm:$0xff]  ;;  %v619_v39 = vld [vmem:[#allocation8 + $0x8] sm:$0xff] }
  0x1c   :  { %176 = vmatpush.bf16.msra.mxu0 %v607_v4  ;;  %639 = vmatpush.bf16.msra.mxu3 %v607_v4  ;;  %v618_v40 = vld [vmem:[#allocation8] sm:$0xff]  ;;  %v653_v42 = vld [vmem:[%s897_s4] ss:$0 sm:$0xff]  ;;  %s805_s4 = smov [#allocation10]  }
  0x1d   :  { %269 = vmatpush.bf16.msra.mxu1 %v615_v5  ;;  %v654_v56 = vld [vmem:[%s899_s6] ss:$0 sm:$0xff]  ;;  %s479_s6 = sshll.u32 %s805_s4, 4  ;;  %s480_s6 = int_to_ptr.vmem [resolvable:$true] %s479_s6 }
  0x1e   :  { %361 = vmatpush.bf16.msra.mxu2 %v624_v20 }
  0x20   :  { %177 = vmatpush.bf16.msra.mxu0 %v606_v6  ;;  %640 = vmatpush.bf16.msra.mxu3 %v606_v6 }
  0x21   :  { %270 = vmatpush.bf16.msra.mxu1 %v614_v7 }
  0x22   :  { %362 = vmatpush.bf16.msra.mxu2 %v623_v22 }
  0x24   :  { %178 = vmatpush.bf16.msra.mxu0 %v605_v8  ;;  %641 = vmatpush.bf16.msra.mxu3 %v605_v8 }
  0x25   :  { %271 = vmatpush.bf16.msra.mxu1 %v613_v14 }
  0x26   :  { %363 = vmatpush.bf16.msra.mxu2 %v622_v27 }
  0x28   :  { %179 = vmatpush.bf16.msra.mxu0 %v604_v9  ;;  %642 = vmatpush.bf16.msra.mxu3 %v604_v9 }
  0x29   :  { %272 = vmatpush.bf16.msra.mxu1 %v612_v15 }
  0x2a   :  { %364 = vmatpush.bf16.msra.mxu2 %v621_v37 }
  0x2c   :  { %180 = vmatpush.bf16.msra.mxu0 %v603_v10  ;;  %643 = vmatpush.bf16.msra.mxu3 %v603_v10 }
  0x2d   :  { %273 = vmatpush.bf16.msra.mxu1 %v611_v16 }
  0x2e   :  { %365 = vmatpush.bf16.msra.mxu2 %v620_v38 }
  0x30   :  { %181 = vmatpush.bf16.msra.mxu0 %v602_v11  ;;  %644 = vmatpush.bf16.msra.mxu3 %v602_v11 }
  0x31   :  { %274 = vmatpush.bf16.msra.mxu1 %v610_v17 }
  0x32   :  { %366 = vmatpush.bf16.msra.mxu2 %v619_v39 }
  0x33   :  { %182 = vmatmul.bf16.vlgmr.msra.gmra.mxu0 %v600_v12  ;;  %187 = vmatmul.bf16.vlgmr.msra.gmra.mxu3 %v601_v13 }
  0x36   :  { %367 = vmatpush.bf16.msra.mxu2 %v618_v40 }
  0xb0   :  { %v183_v19 = vpop.f32.mrf.mxu0 }
  0xb1   :  { %v184_v23 = vadd.f32 %v652_v21, %v183_v19 }
  0xb3   :  { %v193_v28 = vmax.f32 %v184_v23, 0.0 }
  0xb6   :  { %v188_v25 = vpop.f32.mrf.mxu3 }
  0xb7   :  { %v189_v32 = vadd.f32 %v652_v21, %v188_v25 }
  0xb8   :  { %v185_v24 = vpop.f32.mrf.mxu0 }
  0xb9   :  { %v186_v26 = vadd.f32 %v652_v21, %v185_v24  ;;  %v195_v34 = vmax.f32 %v189_v32, 0.0 }
  0xbb   :  { %v194_v29 = vmax.f32 %v186_v26, 0.0 }
  0xbd   :  { %v197_v30 = vpack.c.bf16 %v194_v29, %v193_v28 }
  0xbe   :  { %v190_v31 = vpop.f32.mrf.mxu3 }
  0xbf   :  { %275 = vmatmul.bf16.vlgmr.msra.gmra.mxu1 %v197_v30  ;;  %v191_v33 = vadd.f32 %v652_v21, %v190_v31 }
  0xc1   :  { %v196_v35 = vmax.f32 %v191_v33, 0.0 }
  0xc3   :  { %v198_v36 = vpack.c.bf16 %v196_v35, %v195_v34 }
  0xcf   :  { %280 = vmatmul.bf16.gmra.mxu1 %v198_v36 }
 0x13c   :  { %v276_v41 = vpop.f32.mrf.mxu1 }
 0x13d   :  { %v277_v43 = vadd.f32 %v653_v42, %v276_v41 }
 0x13f   :  { %v286_v46 = vmax.f32 %v277_v43, 0.0 }
 0x144   :  { %v278_v44 = vpop.f32.mrf.mxu1 }
 0x145   :  { %v279_v45 = vadd.f32 %v653_v42, %v278_v44 }
 0x147   :  { %v287_v47 = vmax.f32 %v279_v45, 0.0 }
 0x149   :  { %v290_v48 = vpack.c.bf16 %v287_v47, %v286_v46 }
 0x14b   :  { %368 = vmatmul.bf16.vlgmr.msra.gmra.mxu2 %v290_v48 }
 0x14c   :  { %v281_v49 = vpop.f32.mrf.mxu1 }
 0x14d   :  { %v282_v50 = vadd.f32 %v653_v42, %v281_v49 }
 0x14f   :  { %v288_v53 = vmax.f32 %v282_v50, 0.0 }
 0x154   :  { %v283_v51 = vpop.f32.mrf.mxu1 }
 0x155   :  { %v284_v52 = vadd.f32 %v653_v42, %v283_v51 }
 0x157   :  { %v289_v54 = vmax.f32 %v284_v52, 0.0 }
 0x159   :  { %v291_v55 = vpack.c.bf16 %v289_v54, %v288_v53 }
 0x15b   :  { %373 = vmatmul.bf16.gmra.mxu2 %v291_v55 }
 0x1ce   :  { %v369_v57 = vpop.f32.mrf.mxu2 }
 0x1cf   :  { %v370_v58 = vadd.f32 %v654_v56, %v369_v57 }
 0x1d1   :  { %379 = vmax.xlane.f32.xlu0 %v370_v58 }
 0x1d6   :  { %v371_v59 = vpop.f32.mrf.mxu2 }
 0x1d7   :  { %v372_v60 = vadd.f32 %v654_v56, %v371_v59 }
 0x1d9   :  { %381 = vmax.xlane.f32.xlu0 %v372_v60 }
 0x1de   :  { %v374_v61 = vpop.f32.mrf.mxu2 }
 0x1df   :  { %v375_v62 = vadd.f32 %v654_v56, %v374_v61 }
 0x1e1   :  { %383 = vmax.xlane.f32.xlu1 %v375_v62 }
 0x1e6   :  { %v376_v63 = vpop.f32.mrf.mxu2 }
 0x1e7   :  { %v377_v0 = vadd.f32 %v654_v56, %v376_v63 }
 0x1e9   :  { %385 = vmax.xlane.f32.xlu1 %v377_v0 }
 0x244   :  { %v380_v1 = vpop.xlane.xlu0 %379 }
 0x245   :  { %v387_v2 = vsub.f32 %v370_v58, %v380_v1 }
 0x247   :  { %v391_v3 = vmul.f32 1.442695, %v387_v2 }
 0x249   :  { %655 = vpow2.f32 %v391_v3 }
 0x24c   :  { %v382_v4 = vpop.xlane.xlu0 %381 }
 0x24d   :  { %v388_v5 = vsub.f32 %v372_v60, %v382_v4 }
 0x24f   :  { %v656_v6 = vpop.eup %655  ;;  %v393_v7 = vmul.f32 1.442695, %v388_v5 }
 0x250   :  { %399 = vadd.xlane.f32.xlu2 %v656_v6 }
 0x251   :  { %657 = vpow2.f32 %v393_v7 }
 0x254   :  { %v384_v8 = vpop.xlane.xlu1 %383 }
 0x255   :  { %v389_v9 = vsub.f32 %v375_v62, %v384_v8 }
 0x257   :  { %v658_v10 = vpop.eup %657  ;;  %v395_v11 = vmul.f32 1.442695, %v389_v9 }
 0x258   :  { %401 = vadd.xlane.f32.xlu2 %v658_v10 }
 0x259   :  { %659 = vpow2.f32 %v395_v11 }
 0x25c   :  { %v386_v12 = vpop.xlane.xlu1 %385 }
 0x25d   :  { %v390_v13 = vsub.f32 %v377_v0, %v386_v12 }
 0x25f   :  { %v879_v14 = vpop.eup %659  ;;  %v397_v15 = vmul.f32 1.442695, %v390_v13 }
 0x260   :  { %403 = vadd.xlane.f32.xlu0 %v879_v14 }
 0x261   :  { %661 = vpow2.f32 %v397_v15 }
 0x267   :  { %v882_v16 = vpop.eup %661 }
 0x268   :  { %405 = vadd.xlane.f32.xlu1 %v882_v16 }
 0x2c3   :  { %v400_v17 = vpop.xlane.xlu2 %399 }
 0x2c4   :  { %663 = vrcp.f32 %v400_v17  ;;  %v418_v27 = vand.u32 2147483648, %v400_v17  ;;  %vm412_vm1 = vweird.f32 %v400_v17  ;;  %v416_v28 = vand.u32 2147483647, %v400_v17 }
 0x2c6   :  { %v419_v34 = vor.u32 1.1754944e-38, %v418_v27  ;;  %vm417_vm4 = vcmp.eq.f32.partialorder %v416_v28, 8.507059e+37 }
 0x2ca   :  { %v664_v18 = vpop.eup %663 }
 0x2cb   :  { %v408_v19 = vmul.f32 %v664_v18, %v400_v17  ;;  %v402_v20 = vpop.xlane.xlu2 %401  ;;  %vm413_vm0 = vweird.f32 %v664_v18 }
 0x2cc   :  { %665 = vrcp.f32 %v402_v20  ;;  %vm414_vm2 = vmor %vm412_vm1, %vm413_vm0  ;;  %v432_v30 = vand.u32 2147483648, %v402_v20  ;;  %v430_v33 = vand.u32 2147483647, %v402_v20  ;;  %vm426_vm5 = vweird.f32 %v402_v20 }
 0x2cd   :  { %v409_v21 = vsub.f32 1.0, %v408_v19 }
 0x2ce   :  { %v433_v37 = vor.u32 1.1754944e-38, %v432_v30  ;;  %vm431_vm7 = vcmp.eq.f32.partialorder %v430_v33, 8.507059e+37 }
 0x2cf   :  { %v410_v22 = vmul.f32 %v664_v18, %v409_v21 }
 0x2d1   :  { %v411_v24 = vadd.f32 %v664_v18, %v410_v22 }
 0x2d2   :  { %v666_v23 = vpop.eup %665 }
 0x2d3   :  { %v422_v25 = vmul.f32 %v666_v23, %v402_v20  ;;  %v404_v26 = vpop.xlane.xlu0 %403  ;;  %v415_v31 = vsel %vm414_vm2, %v664_v18, %v411_v24  ;;  %vm427_vm3 = vweird.f32 %v666_v23 }
 0x2d4   :  { %667 = vrcp.f32 %v404_v26  ;;  %vm428_vm6 = vmor %vm426_vm5, %vm427_vm3  ;;  %v420_v38 = vsel %vm417_vm4, %v419_v34, %v415_v31  ;;  %v446_v51 = vand.u32 2147483648, %v404_v26  ;;  %vm440_vm9 = vweird.f32 %v404_v26 }
 0x2d5   :  { %v423_v29 = vsub.f32 1.0, %v422_v25  ;;  %v463_v45 = vmul.f32 %v656_v6, %v420_v38  ;;  %v444_v52 = vand.u32 2147483647, %v404_v26 }
 0x2d6   :  { %v447_v58 = vor.u32 1.1754944e-38, %v446_v51 }
 0x2d7   :  { %v424_v32 = vmul.f32 %v666_v23, %v423_v29  ;;  %vm445_vm12 = vcmp.eq.f32.partialorder %v444_v52, 8.507059e+37 }
 0x2d9   :  { %v425_v35 = vadd.f32 %v666_v23, %v424_v32 }
 0x2da   :  { %v668_v36 = vpop.eup %667 }
 0x2db   :  { %v429_v39 = vsel %vm428_vm6, %v666_v23, %v425_v35  ;;  %v436_v40 = vmul.f32 %v668_v36, %v404_v26  ;;  %v406_v41 = vpop.xlane.xlu1 %405  ;;  %vm441_vm8 = vweird.f32 %v668_v36 }
 0x2dc   :  { %v434_v42 = vsel %vm431_vm7, %v433_v37, %v429_v39  ;;  %669 = vrcp.f32 %v406_v41  ;;  %vm442_vm10 = vmor %vm440_vm9, %vm441_vm8  ;;  %v460_v54 = vand.u32 2147483648, %v406_v41  ;;  %v458_v57 = vand.u32 2147483647, %v406_v41 }
 0x2dd   :  { %v464_v43 = vmul.f32 %v658_v10, %v434_v42  ;;  %v437_v44 = vsub.f32 1.0, %v436_v40  ;;  %vm454_vm13 = vweird.f32 %v406_v41 }
 0x2de   :  { %v461_v61 = vor.u32 1.1754944e-38, %v460_v54  ;;  %vm459_vm15 = vcmp.eq.f32.partialorder %v458_v57, 8.507059e+37 }
 0x2df   :  { %v438_v46 = vmul.f32 %v668_v36, %v437_v44  ;;  %v629_v47 = vpack.c.bf16 %v464_v43, %v463_v45 }
 0x2e1   :  { %630 = vst [vmem:[#allocation10] sm:$0xff] %v629_v47   ;;  %v439_v49 = vadd.f32 %v668_v36, %v438_v46 }
 0x2e2   :  { %v670_v48 = vpop.eup %669 }
 0x2e3   :  { %v450_v50 = vmul.f32 %v670_v48, %v406_v41  ;;  %v443_v55 = vsel %vm442_vm10, %v668_v36, %v439_v49  ;;  %vm455_vm11 = vweird.f32 %v670_v48 }
 0x2e4   :  { %v448_v60 = vsel %vm445_vm12, %v447_v58, %v443_v55  ;;  %vm456_vm14 = vmor %vm454_vm13, %vm455_vm11 }
 0x2e5   :  { %v451_v53 = vsub.f32 1.0, %v450_v50  ;;  %v465_v0 = vmul.f32 %v879_v14, %v448_v60 }
 0x2e7   :  { %v452_v56 = vmul.f32 %v670_v48, %v451_v53 }
 0x2e9   :  { %v453_v59 = vadd.f32 %v670_v48, %v452_v56 }
 0x2eb   :  { %v457_v62 = vsel %vm456_vm14, %v670_v48, %v453_v59 }
 0x2ec   :  { %v462_v63 = vsel %vm459_vm15, %v461_v61, %v457_v62 }
 0x2ed   :  { %v466_v1 = vmul.f32 %v882_v16, %v462_v63 }
 0x2ef   :  { %v634_v2 = vpack.c.bf16 %v466_v1, %v465_v0 }
 0x2f1   :  { %636 = vst [vmem:[#allocation10 + $0x8] sm:$0xff] %v634_v2  }
 0x2f2   :  { %487 = dma.vmem_to_hbm [thread:$0]  %s480_s6, 256, %s482_s26, [#allocation4], %s800_s9, %s800_s9, %s801_s10  }
 0x2f3   :  { %797 = dma.done.wait [#allocation4], 256  }
 0x2f4   :  { %798 = vsyncadd [#allocation4], 4294967040 }
 0x2f5   :  { %492 = vsyncpa [#allocation3], 1 }
 0x2f6   :  { %493 = vsyncpa [#allocation6], 1 }
 0x2f7   :  { %494 = vsyncpa [#allocation9], 1 }
 0x2f8   :  { %495 = vsyncpa [#allocation4], 1 }

</bundles_post_ra>
